<compile_context>
chip_gen: v5e
topology: v5e:2x2
jax: 0.10.0
libtpu: 0.0.40
codegen_flags: <defaults>
</compile_context>

<pallas_src>
import functools

import jax
import jax.numpy as jnp
from jax.experimental import pallas as pl
from jax.experimental.pallas import tpu as pltpu


def conv_block_kernel(p_ref, w_ref, b_ref, o_ref):
    """Fused conv (4 quadrant matmuls) + 2x2 max-pool + bias + ReLU.

    p_ref : (4, K, R)    im2col patches; p_ref[q, k, m] is input tap k of the
                         conv position that is 2x2-pool element q (= 2*di+dj)
                         of pooled output pixel m.  K = KH*KW*CIN.
    w_ref : (COUT, K)    conv weights.
    b_ref : (COUT, 1)    bias.
    o_ref : (COUT, R)    pooled output tile (spatial dim on lanes -> dense vst).
    """
    w = w_ref[...]
    # One MXU matmul per pool-window element; output (COUT, R) keeps the
    # spatial dim lane-dense so no transpose / masked store is needed.
    y0 = jnp.dot(w, p_ref[0], preferred_element_type=jnp.float32)
    y1 = jnp.dot(w, p_ref[1], preferred_element_type=jnp.float32)
    y2 = jnp.dot(w, p_ref[2], preferred_element_type=jnp.float32)
    y3 = jnp.dot(w, p_ref[3], preferred_element_type=jnp.float32)
    # MaxPool2d(2) first; bias (per-row constant) and ReLU (monotone) commute
    # with max, so the epilogue only touches the pooled tile.
    y = jnp.maximum(jnp.maximum(y0, y1), jnp.maximum(y2, y3))
    y = jnp.maximum(y + b_ref[...], 0.0)            # bias + ReLU
    o_ref[...] = y.astype(o_ref.dtype)


def _pick_spatial_tile(M, K, itemsize, budget_bytes=8 * 1024 * 1024):
    """Largest tile of the pooled-spatial dim M that is lane-aligned and fits.

    The tile must divide M and be a multiple of 128 (lane width); otherwise we
    take M whole, which is always legal because block dims equal to the full
    array dim bypass the (8,128) divisibility rule.  The budget bounds the
    double-buffered (4, K, R) patches block (sized for v7x's 64/32 MiB VMEM).
    """
    if M % 128 != 0:
        return M
    best = 128
    for r in range(128, M + 1, 128):
        if M % r == 0 and 2 * 4 * K * r * itemsize <= budget_bytes:
            best = r
    return best


def conv_block(x_nchw, weight_oihw, bias, padding, *, use_bf16=False):
    """Equivalent of ConvBlock.forward (Conv2d + ReLU + MaxPool2d(2)), NCHW."""
    N, CIN, H, W = x_nchw.shape
    COUT, CIN2, KH, KW = weight_oihw.shape
    assert CIN == CIN2
    ph, pw = (padding, padding) if isinstance(padding, int) else padding

    Hc = H + 2 * ph - KH + 1          # conv output height (stride 1)
    Wc = W + 2 * pw - KW + 1          # conv output width
    Ho, Wo = Hc // 2, Wc // 2         # after MaxPool2d(2) (floor semantics)
    assert Ho > 0 and Wo > 0
    M = Ho * Wo
    K = KH * KW * CIN

    # ---- wrapper-side layout glue (pure JAX) -------------------------------
    # Stays in NCHW (no NHWC round trip).  Strided quadrant slices build the
    # im2col patches directly; nothing but the final (N, 4, K, M) array --
    # spatial dim last, hence lane-dense -- is materialized.
    x = jnp.pad(x_nchw, ((0, 0), (0, 0), (ph, ph), (pw, pw)))   # (N,CIN,Hp,Wp)
    quads = []
    for di in range(2):
        for dj in range(2):
            taps = [
                x[:, :,
                  kh + di: kh + di + 2 * Ho - 1: 2,
                  kw + dj: kw + dj + 2 * Wo - 1: 2]
                for kh in range(KH) for kw in range(KW)
            ]                                                    # (N,CIN,Ho,Wo)
            quads.append(jnp.concatenate(taps, axis=1).reshape(N, K, M))
    patches = jnp.stack(quads, axis=1)                           # (N, 4, K, M)

    # K index = (kh*KW + kw)*CIN + c, matching the tap concat order above.
    w = jnp.transpose(weight_oihw, (0, 2, 3, 1)).reshape(COUT, K)  # (COUT, K)
    b = bias.reshape(COUT, 1).astype(jnp.float32)

    if use_bf16:
        # Halves patches HBM/DMA/VMEM bytes; accumulation stays f32 via
        # preferred_element_type.  Tolerance loosens to ~1e-2.
        patches = patches.astype(jnp.bfloat16)
        w = w.astype(jnp.bfloat16)

    R = _pick_spatial_tile(M, K, patches.dtype.itemsize)
    T = M // R

    out_flat = pl.pallas_call(
        conv_block_kernel,
        out_shape=jax.ShapeDtypeStruct((N, COUT, M), x_nchw.dtype),
        grid=(N, T),
        in_specs=[
            # one batch element, all 4 pool quadrants, one spatial tile.
            # TODO(synk): add pipeline_mode=pl.Buffered(3) here if profiling
            # shows the patches DMA still exposed after tiling.
            pl.BlockSpec((None, 4, K, R), lambda n, t: (n, 0, 0, t)),
            # weights / bias: constant index -> resident across the grid.
            pl.BlockSpec((COUT, K), lambda n, t: (0, 0)),
            pl.BlockSpec((COUT, 1), lambda n, t: (0, 0)),
        ],
        out_specs=pl.BlockSpec((None, COUT, R), lambda n, t: (n, 0, t)),
        compiler_params=pltpu.CompilerParams(
            # batch and spatial tiles are independent -> megacore can split.
            dimension_semantics=("parallel", "parallel"),
            # above v5e's 16 MiB scoped default, within v7x's 64 MiB physical.
            vmem_limit_bytes=32 * 1024 * 1024,
        ),
    )(patches, w, b)

    # (N, COUT, Ho*Wo) reshapes straight to NCHW -- no output transpose.
    return out_flat.reshape(N, COUT, Ho, Wo)


if __name__ == "__main__":
    key = jax.random.PRNGKey(0)
    kx, kw, kb = jax.random.split(key, 3)

    # Small shapes consistent with the module's forward pass.
    N, CIN, H, W = 2, 4, 16, 16
    COUT, KH, KW, PAD = 8, 3, 3, 1

    x = jax.random.normal(kx, (N, CIN, H, W), dtype=jnp.float32)

    # Deterministic params, PyTorch-Conv2d-like uniform init.
    fan_in = CIN * KH * KW
    bound = 1.0 / (fan_in ** 0.5)
    weight = jax.random.uniform(kw, (COUT, CIN, KH, KW), jnp.float32, -bound, bound)
    bias = jax.random.uniform(kb, (COUT,), jnp.float32, -bound, bound)

    out = jax.jit(functools.partial(conv_block, padding=PAD))(x, weight, bias)
    out = jax.block_until_ready(out)

    # Pure-JAX reference: conv + bias + relu + 2x2 max-pool (NCHW, PyTorch-like).
    ref = jax.lax.conv_general_dilated(
        x, weight, window_strides=(1, 1), padding=((PAD, PAD), (PAD, PAD)),
        dimension_numbers=("NCHW", "OIHW", "NCHW"))
    ref = jnp.maximum(ref + bias[None, :, None, None], 0.0)
    ref = jax.lax.reduce_window(ref, -jnp.inf, jax.lax.max,
                                (1, 1, 2, 2), (1, 1, 2, 2), "VALID")

    assert out.shape == ref.shape == (N, COUT, H // 2, W // 2)
    err = float(jnp.max(jnp.abs(out - ref)))
    assert jnp.allclose(out, ref, atol=1e-4, rtol=1e-4), err
    print("KERNEL_OK")
</pallas_src>

<mosaic_0001>
module attributes {stable_mosaic.version = 11 : i64} {
  func.func @conv_block_kernel(%arg0: i32, %arg1: i32, %arg2: memref<1x4x36x64xf32, #tpu.memory_space<vmem>>, %arg3: memref<8x36xf32, #tpu.memory_space<vmem>>, %arg4: memref<8x1xf32, #tpu.memory_space<vmem>>, %arg5: memref<1x8x64xf32, #tpu.memory_space<vmem>>) attributes {dimension_semantics = [#tpu.dimension_semantics<parallel>, #tpu.dimension_semantics<parallel>], iteration_bounds = array<i64: 2, 1>, scalar_prefetch = 0 : i64, scratch_operands = 0 : i64, tpu.core_type = #tpu.core_type<tc>, window_params = [{transform_indices = @transform_0, window_bounds = array<i64: 1, 4, 36, 64>}, {pipeline_mode = #tpu.pipeline_mode<synchronous>, transform_indices = @transform_1, window_bounds = array<i64: 8, 36>}, {pipeline_mode = #tpu.pipeline_mode<synchronous>, transform_indices = @transform_2, window_bounds = array<i64: 8, 1>}, {transform_indices = @transform_3, window_bounds = array<i64: 1, 8, 64>}]} {
    %c0 = arith.constant 0 : index
    %c0_0 = arith.constant 0 : index
    %0 = vector.load %arg3[%c0, %c0_0] : memref<8x36xf32, #tpu.memory_space<vmem>>, vector<8x36xf32>
    %c0_1 = arith.constant 0 : index
    %c0_2 = arith.constant 0 : index
    %c0_3 = arith.constant 0 : index
    %c0_4 = arith.constant 0 : index
    %1 = vector.load %arg2[%c0_1, %c0_2, %c0_3, %c0_4] : memref<1x4x36x64xf32, #tpu.memory_space<vmem>>, vector<1x1x36x64xf32>
    %2 = vector.shape_cast %1 : vector<1x1x36x64xf32> to vector<36x64xf32>
    %cst = arith.constant dense<0.000000e+00> : vector<8x64xf32>
    %3 = tpu.matmul %0, %2, %cst {dimension_numbers = #tpu.dot_dimension_numbers<[1], [0], [0], [1], [0, 0, 1, 1], [], []>} : vector<8x36xf32>, vector<36x64xf32>, vector<8x64xf32> -> vector<8x64xf32>
    %c0_5 = arith.constant 0 : index
    %c1 = arith.constant 1 : index
    %c0_6 = arith.constant 0 : index
    %c0_7 = arith.constant 0 : index
    %4 = vector.load %arg2[%c0_5, %c1, %c0_6, %c0_7] : memref<1x4x36x64xf32, #tpu.memory_space<vmem>>, vector<1x1x36x64xf32>
    %5 = vector.shape_cast %4 : vector<1x1x36x64xf32> to vector<36x64xf32>
    %cst_8 = arith.constant dense<0.000000e+00> : vector<8x64xf32>
    %6 = tpu.matmul %0, %5, %cst_8 {dimension_numbers = #tpu.dot_dimension_numbers<[1], [0], [0], [1], [0, 0, 1, 1], [], []>} : vector<8x36xf32>, vector<36x64xf32>, vector<8x64xf32> -> vector<8x64xf32>
    %c0_9 = arith.constant 0 : index
    %c2 = arith.constant 2 : index
    %c0_10 = arith.constant 0 : index
    %c0_11 = arith.constant 0 : index
    %7 = vector.load %arg2[%c0_9, %c2, %c0_10, %c0_11] : memref<1x4x36x64xf32, #tpu.memory_space<vmem>>, vector<1x1x36x64xf32>
    %8 = vector.shape_cast %7 : vector<1x1x36x64xf32> to vector<36x64xf32>
    %cst_12 = arith.constant dense<0.000000e+00> : vector<8x64xf32>
    %9 = tpu.matmul %0, %8, %cst_12 {dimension_numbers = #tpu.dot_dimension_numbers<[1], [0], [0], [1], [0, 0, 1, 1], [], []>} : vector<8x36xf32>, vector<36x64xf32>, vector<8x64xf32> -> vector<8x64xf32>
    %c0_13 = arith.constant 0 : index
    %c3 = arith.constant 3 : index
    %c0_14 = arith.constant 0 : index
    %c0_15 = arith.constant 0 : index
    %10 = vector.load %arg2[%c0_13, %c3, %c0_14, %c0_15] : memref<1x4x36x64xf32, #tpu.memory_space<vmem>>, vector<1x1x36x64xf32>
    %11 = vector.shape_cast %10 : vector<1x1x36x64xf32> to vector<36x64xf32>
    %cst_16 = arith.constant dense<0.000000e+00> : vector<8x64xf32>
    %12 = tpu.matmul %0, %11, %cst_16 {dimension_numbers = #tpu.dot_dimension_numbers<[1], [0], [0], [1], [0, 0, 1, 1], [], []>} : vector<8x36xf32>, vector<36x64xf32>, vector<8x64xf32> -> vector<8x64xf32>
    %13 = arith.maximumf %3, %6 : vector<8x64xf32>
    %14 = arith.maximumf %9, %12 : vector<8x64xf32>
    %15 = arith.maximumf %13, %14 : vector<8x64xf32>
    %c0_17 = arith.constant 0 : index
    %c0_18 = arith.constant 0 : index
    %16 = vector.load %arg4[%c0_17, %c0_18] : memref<8x1xf32, #tpu.memory_space<vmem>>, vector<8x1xf32>
    %17 = vector.broadcast %16 : vector<8x1xf32> to vector<8x64xf32>
    %18 = arith.addf %15, %17 : vector<8x64xf32>
    %cst_19 = arith.constant 0.000000e+00 : f32
    %19 = vector.broadcast %cst_19 : f32 to vector<8x64xf32>
    %20 = arith.maximumf %18, %19 : vector<8x64xf32>
    %c0_20 = arith.constant 0 : index
    %c0_21 = arith.constant 0 : index
    %c0_22 = arith.constant 0 : index
    %21 = vector.load %arg5[%c0_20, %c0_21, %c0_22] : memref<1x8x64xf32, #tpu.memory_space<vmem>>, vector<1x8x64xf32>
    %22 = vector.shape_cast %21 : vector<1x8x64xf32> to vector<8x64xf32>
    %23 = vector.shape_cast %20 : vector<8x64xf32> to vector<1x8x64xf32>
    tpu.vector_store %arg5[%c0_20, %c0_21, %c0_22], %23 {strides = array<i32>} : memref<1x8x64xf32, #tpu.memory_space<vmem>>, vector<1x8x64xf32>,
    return
  }
  func.func @transform_0(%arg0: i32, %arg1: i32) -> (i32, i32, i32, i32) {
    %c0_i32 = arith.constant 0 : i32
    %c0_i32_0 = arith.constant 0 : i32
    %c0_i32_1 = arith.constant 0 : i32
    return %arg0, %c0_i32, %c0_i32_0, %arg1 : i32, i32, i32, i32
  }
  func.func @transform_1(%arg0: i32, %arg1: i32) -> (i32, i32) {
    %c0_i32 = arith.constant 0 : i32
    %c0_i32_0 = arith.constant 0 : i32
    %c0_i32_1 = arith.constant 0 : i32
    return %c0_i32, %c0_i32_0 : i32, i32
  }
  func.func @transform_2(%arg0: i32, %arg1: i32) -> (i32, i32) {
    %c0_i32 = arith.constant 0 : i32
    %c0_i32_0 = arith.constant 0 : i32
    %c0_i32_1 = arith.constant 0 : i32
    return %c0_i32, %c0_i32_0 : i32, i32
  }
  func.func @transform_3(%arg0: i32, %arg1: i32) -> (i32, i32, i32) {
    %c0_i32 = arith.constant 0 : i32
    %c0_i32_0 = arith.constant 0 : i32
    return %arg0, %c0_i32, %arg1 : i32, i32, i32
  }
}

</mosaic_0001>

<bundles_post_ra>
// kernel: conv_block.1
= control target key start
LH: loop header
LB: loop body
LE: loop exit
PB: predicated region body
PF: predicated region fallthrough
CT: control target
= control target key end

     0   :  { %s515_s12 = smov 0   ;;  %s517_s13 = smov 0   ;;  %s588_s0 = inlined_call_operand.vmem [shape: f32[2,4,36,64], index: 0, kind: input, shape index: {}]   ;;  %s589_s1 = inlined_call_operand.vmem [shape: f32[8,36], index: 1, kind: input, shape index: {}]   ;;  %s590_s2 = inlined_call_operand.vmem [shape: f32[8,1], index: 2, kind: input, shape index: {}]   ;;  %s591_s3 = inlined_call_operand.vmem [shape: f32[2,8,64], index: 3, kind: output, shape index: {}]  }
   0x1   :  { %s519_s14 = smov 0  }
   0x2 LB: > { %s25_s15 = sadd.s32 1, %s488_s13  ;;  %p415_p0 = scmp.ge.s32.totalorder %s492_s14, 1  ;;  %s492_s14 = sphi %s519_s14, %s13_s14   ;;  %s488_s13 = sphi %s517_s13, %s593_s13   ;;  %s484_s12 = sphi %s515_s12, %s592_s12  }
   0x3   : > { %p27_p1 = scmp.ge.s32.totalorder %s25_s15, 2  ;;  %p156_p2 = scmp.lt.s32.totalorder %s492_s14, 3 }
   0x5   : > { %s595_s15 = smov (%p27_p1, %s25_s15), 0  ;;  %p157_p3 = pnand %p415_p0, %p156_p2 }
   0x6   : > { %p185_p4 = scmp.lt.s32.totalorder (!%p157_p3), %s484_s12, 1 }
   0x7   : > { %160 = sbr.rel (%p157_p3) target bundleno = 167 (0xa7), region = 32 }
   0xc   : > { %v324_v0 = vld [vmem:[%s590_s2] sm:$0xff]  ;;  %v494_v1 = vmov 0   ;;  %s597_s12 = smov (!%p185_p4, %s484_s12), 1  ;;  %vm210_vm0 = vcmask 1043456   ;;  %vm206_vm1 = vcmask 293888   ;;  %vm332_vm2 = vcmask 523264  }
   0xd   : > { %469 = vset.pattern.permute.xlu0 %v494_v1  ;;  %s443_s18 = smul.u32 160, %s597_s12  ;;  %v200_v18 = vld [vmem:[%s589_s1] sm:$0xff]  ;;  %s417_s24 = sshll.u32 %s597_s12, 3 }
   0xe   : > { %327 = vperm.xlu0 %469, %v324_v0   ;;  %s199_s27 = scalar_lea.vmem %s591_s3, %s417_s24 }
   0xf   : > { %s542_s21 = scalar_lea.vmem %s588_s0, %s443_s18 }
  0x10   : > { %v431_v2 = vld [vmem:[%s542_s21 + $0x70] sm:$0xf]  ;;  %v438_v3 = vld [vmem:[%s542_s21 + $0x98] sm:$0xf]  ;;  %v430_v4 = vld [vmem:[%s542_s21 + $0x68] sm:$0xff] }
  0x11   : > { %432 = vmatpush.msk.msra.mxu2 %vm210_vm0, %v431_v2  ;;  %439 = vmatpush.msk.msra.mxu3 %vm210_vm0, %v438_v3  ;;  %v437_v5 = vld [vmem:[%s542_s21 + $0x90] sm:$0xff]  ;;  %v429_v6 = vld [vmem:[%s542_s21 + $0x60] sm:$0xff]  ;;  %v436_v7 = vld [vmem:[%s542_s21 + $0x88] sm:$0xff] }
  0x12   : > { %v205_v8 = vld [vmem:[%s542_s21 + $0x20] sm:$0xf]  ;;  %v424_v9 = vld [vmem:[%s542_s21 + $0x48] sm:$0xf]  ;;  %v204_v10 = vld [vmem:[%s542_s21 + $0x18] sm:$0xff] }
  0x13   : > { %284 = vmatpush.msra.mxu2 %v430_v4  ;;  %313 = vmatpush.msra.mxu3 %v437_v5  ;;  %v423_v11 = vld [vmem:[%s542_s21 + $0x40] sm:$0xff]  ;;  %v428_v12 = vld [vmem:[%s542_s21 + $0x58] sm:$0xff]  ;;  %v203_v14 = vld [vmem:[%s542_s21 + $0x10] sm:$0xff] }
  0x14   : > { %418 = vmatpush.msk.msra.mxu0 %vm210_vm0, %v205_v8  ;;  %425 = vmatpush.msk.msra.mxu1 %vm210_vm0, %v424_v9  ;;  %v435_v13 = vld [vmem:[%s542_s21 + $0x80] sm:$0xff]  ;;  %v422_v15 = vld [vmem:[%s542_s21 + $0x38] sm:$0xff]  ;;  %v427_v16 = vld [vmem:[%s542_s21 + $0x50] sm:$0xff] }
  0x15   : > { %285 = vmatpush.msra.mxu2 %v429_v6  ;;  %314 = vmatpush.msra.mxu3 %v436_v7  ;;  %v434_v17 = vld [vmem:[%s542_s21 + $0x78] sm:$0xff]  ;;  %v202_v19 = vld [vmem:[%s542_s21 + $0x8] sm:$0xff]  ;;  %v421_v20 = vld [vmem:[%s542_s21 + $0x30] sm:$0xff] }
  0x16   : > { %226 = vmatpush.msra.mxu0 %v204_v10  ;;  %255 = vmatpush.msra.mxu1 %v423_v11  ;;  %v201_v21 = vld [vmem:[%s542_s21] sm:$0xff]  ;;  %v420_v22 = vld [vmem:[%s542_s21 + $0x28] sm:$0xff] }
  0x17   : > { %286 = vmatpush.msra.mxu2 %v428_v12  ;;  %315 = vmatpush.msra.mxu3 %v435_v13 }
  0x18   : > { %227 = vmatpush.msra.mxu0 %v203_v14  ;;  %256 = vmatpush.msra.mxu1 %v422_v15 }
  0x19   : > { %287 = vmatpush.msra.mxu2 %v427_v16  ;;  %316 = vmatpush.msra.mxu3 %v434_v17 }
  0x1a   : > { %433 = vmatmul.msk.f32.vlgmr.msra.gmra.mxu2 %vm206_vm1, %v200_v18  ;;  %440 = vmatmul.msk.f32.vlgmr.msra.gmra.mxu3 %vm206_vm1, %v200_v18 }
  0x1b   : > { %228 = vmatpush.msra.mxu0 %v202_v19  ;;  %257 = vmatpush.msra.mxu1 %v421_v20 }
  0x1d   : > { %229 = vmatpush.msra.mxu0 %v201_v21  ;;  %258 = vmatpush.msra.mxu1 %v420_v22 }
  0x1e   : > { %419 = vmatmul.msk.f32.vlgmr.msra.gmra.mxu0 %vm206_vm1, %v200_v18  ;;  %426 = vmatmul.msk.f32.vlgmr.msra.gmra.mxu1 %vm206_vm1, %v200_v18 }
  0x80   : > { %v328_v29 = vpop.permute.xlu0 %327 }
  0x9b   : > { %v231_v23 = vpop.f32.mrf.mxu0  ;;  %v260_v24 = vpop.f32.mrf.mxu1 }
  0x9c   : > { %v321_v25 = vmax.f32 %v231_v23, %v260_v24 }
  0x9d   : > { %v289_v26 = vpop.f32.mrf.mxu2  ;;  %v318_v27 = vpop.f32.mrf.mxu3 }
  0x9e   : > { %v322_v28 = vmax.f32 %v289_v26, %v318_v27 }
  0xa0   : > { %v323_v30 = vmax.f32 %v321_v25, %v322_v28 }
  0xa2   : > { %v330_v31 = vadd.f32 %v328_v29, %v323_v30 }
  0xa4   : > { %v331_v32 = vmax.f32 %v330_v31, 0.0 }
  0xa6   : > { %333 = vst.msk [vmem:[%s199_s27] sm:$0xff] %vm332_vm2, %v331_v32 }
  0xa7 PF: > { %s13_s14 = sadd.s32 1, %s492_s14   ;;  %s592_s12 = smov %s488_s13 }
  0xa8   : > { %p10_p5 = scmp.ge.s32.totalorder %s13_s14, 4   ;;  %s593_s13 = smov %s595_s15 }
  0xaa   :  { %12 = sbr.rel (!%p10_p5) target bundleno = 2 (0x2), region = 65 }

</bundles_post_ra>
